<compile_context>
chip_gen: v7x
topology: tpu7x:2x2x1
jax: 0.10.0
libtpu: 0.0.40
codegen_flags: <defaults>
</compile_context>

<pallas_src>
import math

import jax
import jax.numpy as jnp
from jax.experimental import pallas as pl
from jax.experimental.pallas import tpu as pltpu


def _low_rank_rotated_intervention_kernel(
    base_ref, source_ref, rot_ref, rot_t_ref, out_ref
):
    # base_ref / source_ref / out_ref : VMEM tiles [block_rows, hidden]
    # rot_ref   : VMEM-resident rotation matrix   [hidden, r]
    # rot_t_ref : VMEM-resident transposed matrix [r, hidden]
    base = base_ref[...]
    # Keep the big tiles in their native dtype; MXU accumulates in f32.
    delta = source_ref[...] - base
    rotated = jnp.dot(delta, rot_ref[...], preferred_element_type=jnp.float32)
    update = jnp.dot(rotated, rot_t_ref[...], preferred_element_type=jnp.float32)
    out_ref[...] = (base + update).astype(out_ref.dtype)


def low_rank_rotated_space_intervention(base, source, rotation, *, block_rows=None):
    """out = base + ((source - base) @ R) @ R^T, cast back to base.dtype."""
    assert base.shape == source.shape
    orig_shape = base.shape
    hidden = orig_shape[-1]
    assert rotation.shape[0] == hidden
    r = rotation.shape[1]
    rows = math.prod(orig_shape[:-1])

    base2d = base.reshape(rows, hidden)
    source2d = source.reshape(rows, hidden)
    rot = rotation
    rot_t = rotation.T

    itemsize = jnp.dtype(base.dtype).itemsize
    rot_itemsize = jnp.dtype(rotation.dtype).itemsize
    # Sublane packing: 8 rows for f32, 16 for bf16, 32 for int8/fp8.
    sublane = max(8, 32 // itemsize)

    # --- VMEM budget (generation-aware) --------------------------------------
    try:
        phys_vmem = int(pltpu.get_tpu_info().vmem_capacity_bytes)
    except Exception:  # conservative fallback = v7x's 64 MiB per TensorCore
        phys_vmem = 64 * 1024 * 1024
    vmem_limit = (phys_vmem * 3) // 4  # ~96 MiB on v5e/v6e, ~48 MiB on v7x

    # Resident R / R^T (default double-buffered by the pipeline) + headroom.
    weight_bytes = 2 * 2 * hidden * r * rot_itemsize
    headroom = 2 * 1024 * 1024
    tile_budget = max(vmem_limit - weight_bytes - headroom, 1 * 1024 * 1024)
    # Per-row bytes: base/source/out x 2 pipeline buffers (native dtype)
    # + ~2 f32-wide temporaries + the f32 low-rank row.
    bytes_per_row = hidden * (6 * itemsize + 8) + 4 * r
    max_rows_vmem = max(sublane, (tile_budget // bytes_per_row) // sublane * sublane)

    target = 1024 if block_rows is None else block_rows
    br = max(sublane, (min(target, max_rows_vmem) // sublane) * sublane)

    # --- grid shaping ---------------------------------------------------------
    if rows <= sublane:
        br = rows  # single full-extent block (satisfies tiling rule)
    else:
        # Keep at least 2-4 grid steps when rows allow: megacore sharding on
        # v7x + double-buffered DMA/compute overlap everywhere.
        if rows >= 4 * sublane:
            min_grid = 4
        elif rows >= 2 * sublane:
            min_grid = 2
        else:
            min_grid = 1
        if min_grid > 1:
            per_block = -(-rows // min_grid)
            per_block = -(-per_block // sublane) * sublane
            br = min(br, per_block)
        # Never use a block taller than the (sublane-rounded) row count.
        br = min(br, -(-rows // sublane) * sublane)
        br = max(sublane, br)

    grid = (pl.cdiv(rows, br),)

    cost = pl.CostEstimate(
        flops=int(4 * rows * hidden * r),
        transcendentals=0,
        bytes_accessed=int(3 * rows * hidden * itemsize + 2 * hidden * r * rot_itemsize),
    )

    out2d = pl.pallas_call(
        _low_rank_rotated_intervention_kernel,
        out_shape=jax.ShapeDtypeStruct((rows, hidden), base.dtype),
        grid_spec=pltpu.PrefetchScalarGridSpec(
            num_scalar_prefetch=0,
            grid=grid,
            in_specs=[
                pl.BlockSpec((br, hidden), lambda i: (i, 0)),   # base tile
                pl.BlockSpec((br, hidden), lambda i: (i, 0)),   # source tile
                pl.BlockSpec((hidden, r), lambda i: (0, 0)),    # R (resident)
                pl.BlockSpec((r, hidden), lambda i: (0, 0)),    # R^T (resident)
            ],
            out_specs=pl.BlockSpec((br, hidden), lambda i: (i, 0)),
        ),
        compiler_params=pltpu.CompilerParams(
            dimension_semantics=("parallel",),
            vmem_limit_bytes=int(vmem_limit),
        ),
        cost_estimate=cost,
        # PyTorch semantics are clone-then-update: reuse base's HBM buffer when
        # it is dead after this op (XLA inserts a copy otherwise).
        input_output_aliases={0: 0},
    )(base2d, source2d, rot, rot_t)

    return out2d.reshape(orig_shape)


def _reference_forward(base, source, rotation):
    # Mirrors the PyTorch module's forward exactly.
    rotated_base = jnp.matmul(base.astype(rotation.dtype), rotation)
    rotated_source = jnp.matmul(source.astype(rotation.dtype), rotation)
    out = base + jnp.matmul(rotated_source - rotated_base, rotation.T)
    return out.astype(base.dtype)


if __name__ == "__main__":
    key = jax.random.PRNGKey(0)
    k0, k1, k2, k3, k4, k5, k6 = jax.random.split(key, 7)

    hidden, low_rank = 32, 4
    # Orthogonal low-rank rotation (as produced by the parametrized rotate_layer).
    rotation = jnp.linalg.qr(
        jax.random.normal(k2, (hidden, low_rank), dtype=jnp.float32)
    )[0]

    # --- test 1: module-consistent small shapes (2-block f32 path) -----------
    batch, seq = 2, 8
    base = jax.random.normal(k0, (batch, seq, hidden), dtype=jnp.float32)
    source = jax.random.normal(k1, (batch, seq, hidden), dtype=jnp.float32)
    out = jax.block_until_ready(low_rank_rotated_space_intervention(base, source, rotation))
    ref = _reference_forward(base, source, rotation)
    assert out.shape == base.shape and out.dtype == base.dtype
    assert jnp.allclose(out, ref, rtol=1e-5, atol=1e-5), "test1 mismatch vs reference"

    # --- test 2: multi-block grid with a partial (masked) last block ---------
    batch2, seq2 = 3, 100  # rows=300 -> 4 blocks of 80 rows, last block is partial
    base2 = jax.random.normal(k3, (batch2, seq2, hidden), dtype=jnp.float32)
    source2 = jax.random.normal(k4, (batch2, seq2, hidden), dtype=jnp.float32)
    out2 = jax.block_until_ready(
        low_rank_rotated_space_intervention(base2, source2, rotation)
    )
    ref2 = _reference_forward(base2, source2, rotation)
    assert jnp.allclose(out2, ref2, rtol=1e-5, atol=1e-5), "test2 mismatch vs reference"

    # --- test 3: bf16 inputs (16-row sublane packing, no in-kernel up-cast) --
    batch3, seq3 = 2, 24  # rows=48 -> 2 blocks of 32 rows (bf16 sublane = 16)
    base3 = jax.random.normal(k5, (batch3, seq3, hidden), dtype=jnp.bfloat16)
    source3 = jax.random.normal(k6, (batch3, seq3, hidden), dtype=jnp.bfloat16)
    out3 = jax.block_until_ready(
        low_rank_rotated_space_intervention(base3, source3, rotation)
    )
    ref3 = _reference_forward(base3, source3, rotation)
    assert out3.dtype == jnp.bfloat16
    assert jnp.allclose(
        out3.astype(jnp.float32), ref3.astype(jnp.float32), rtol=5e-2, atol=5e-2
    ), "test3 (bf16) mismatch vs reference"

    # TODO(synk): `subspaces` / subspace_partition / interchange_dim kwargs from
    # the Intervention base class are not used by
    # LowRankRotatedSpaceIntervention.forward, so they are not modeled here.
    print("KERNEL_OK")
</pallas_src>

<mosaic_0001>
module attributes {stable_mosaic.version = 11 : i64} {
  func.func @_low_rank_rotated_intervention_kernel(%arg0: i32, %arg1: memref<8x32xf32, #tpu.memory_space<vmem>>, %arg2: memref<8x32xf32, #tpu.memory_space<vmem>>, %arg3: memref<32x4xf32, #tpu.memory_space<vmem>>, %arg4: memref<4x32xf32, #tpu.memory_space<vmem>>, %arg5: memref<8x32xf32, #tpu.memory_space<vmem>>) attributes {dimension_semantics = [#tpu.dimension_semantics<parallel>], iteration_bounds = array<i64: 2>, scalar_prefetch = 0 : i64, scratch_operands = 0 : i64, tpu.core_type = #tpu.core_type<tc>, window_params = [{transform_indices = @transform_0, window_bounds = array<i64: 8, 32>}, {transform_indices = @transform_1, window_bounds = array<i64: 8, 32>}, {pipeline_mode = #tpu.pipeline_mode<synchronous>, transform_indices = @transform_2, window_bounds = array<i64: 32, 4>}, {pipeline_mode = #tpu.pipeline_mode<synchronous>, transform_indices = @transform_3, window_bounds = array<i64: 4, 32>}, {transform_indices = @transform_4, window_bounds = array<i64: 8, 32>}]} {
    %c0 = arith.constant 0 : index
    %c0_0 = arith.constant 0 : index
    %0 = vector.load %arg1[%c0, %c0_0] : memref<8x32xf32, #tpu.memory_space<vmem>>, vector<8x32xf32>
    %c0_1 = arith.constant 0 : index
    %c0_2 = arith.constant 0 : index
    %1 = vector.load %arg2[%c0_1, %c0_2] : memref<8x32xf32, #tpu.memory_space<vmem>>, vector<8x32xf32>
    %2 = arith.subf %1, %0 : vector<8x32xf32>
    %c0_3 = arith.constant 0 : index
    %c0_4 = arith.constant 0 : index
    %3 = vector.load %arg3[%c0_3, %c0_4] : memref<32x4xf32, #tpu.memory_space<vmem>>, vector<32x4xf32>
    %cst = arith.constant dense<0.000000e+00> : vector<8x4xf32>
    %4 = tpu.matmul %2, %3, %cst {dimension_numbers = #tpu.dot_dimension_numbers<[1], [0], [0], [1], [0, 0, 1, 1], [], []>} : vector<8x32xf32>, vector<32x4xf32>, vector<8x4xf32> -> vector<8x4xf32>
    %c0_5 = arith.constant 0 : index
    %c0_6 = arith.constant 0 : index
    %5 = vector.load %arg4[%c0_5, %c0_6] : memref<4x32xf32, #tpu.memory_space<vmem>>, vector<4x32xf32>
    %cst_7 = arith.constant dense<0.000000e+00> : vector<8x32xf32>
    %6 = tpu.matmul %4, %5, %cst_7 {dimension_numbers = #tpu.dot_dimension_numbers<[1], [0], [0], [1], [0, 0, 1, 1], [], []>} : vector<8x4xf32>, vector<4x32xf32>, vector<8x32xf32> -> vector<8x32xf32>
    %7 = arith.addf %0, %6 : vector<8x32xf32>
    %c0_8 = arith.constant 0 : index
    %c0_9 = arith.constant 0 : index
    %8 = vector.load %arg5[%c0_8, %c0_9] : memref<8x32xf32, #tpu.memory_space<vmem>>, vector<8x32xf32>
    tpu.vector_store %arg5[%c0_8, %c0_9], %7 {strides = array<i32>} : memref<8x32xf32, #tpu.memory_space<vmem>>, vector<8x32xf32>,
    return
  }
  func.func @transform_0(%arg0: i32) -> (i32, i32) {
    %c0_i32 = arith.constant 0 : i32
    %c0_i32_0 = arith.constant 0 : i32
    return %arg0, %c0_i32 : i32, i32
  }
  func.func @transform_1(%arg0: i32) -> (i32, i32) {
    %c0_i32 = arith.constant 0 : i32
    %c0_i32_0 = arith.constant 0 : i32
    return %arg0, %c0_i32 : i32, i32
  }
  func.func @transform_2(%arg0: i32) -> (i32, i32) {
    %c0_i32 = arith.constant 0 : i32
    %c0_i32_0 = arith.constant 0 : i32
    %c0_i32_1 = arith.constant 0 : i32
    return %c0_i32, %c0_i32_0 : i32, i32
  }
  func.func @transform_3(%arg0: i32) -> (i32, i32) {
    %c0_i32 = arith.constant 0 : i32
    %c0_i32_0 = arith.constant 0 : i32
    %c0_i32_1 = arith.constant 0 : i32
    return %c0_i32, %c0_i32_0 : i32, i32
  }
  func.func @transform_4(%arg0: i32) -> (i32, i32) {
    %c0_i32 = arith.constant 0 : i32
    %c0_i32_0 = arith.constant 0 : i32
    return %arg0, %c0_i32 : i32, i32
  }
}

</mosaic_0001>

<bundles_post_ra>
// kernel: tpu_custom_call.1
= control target key start
LH: loop header
LB: loop body
LE: loop exit
PB: predicated region body
PF: predicated region fallthrough
CT: control target
= control target key end

     0   :  { %9 = vsyncpa [#allocation3], 0  ;;  %s897_s0 = inlined_call_operand.hbm [shape: f32[16,32], index: 0, kind: input, shape index: {}, may-alias: {0,4}]   ;;  %s898_s1 = inlined_call_operand.vmem [shape: f32[16,32], index: 1, kind: input, shape index: {}]   ;;  %s899_s2 = inlined_call_operand.vmem [shape: f32[32,4], index: 2, kind: input, shape index: {}]   ;;  %s900_s3 = inlined_call_operand.vmem [shape: f32[4,32], index: 3, kind: input, shape index: {}]   ;;  %s901_s4 = inlined_call_operand.hbm [shape: f32[16,32], index: 4, kind: output, shape index: {}, may-alias: {0,4}]  }
   0x1   :  { %11 = vsyncpa [#allocation3 + $0x1], 0 }
   0x2   :  { %12 = vsyncpa [#allocation4], 0 }
   0x3   :  { %14 = vsyncpa [#allocation4 + $0x1], 0  ;;  %s710_s15 = smov 0   ;;  %s712_s16 = smov 0  }
   0x4   :  { %s714_s17 = smov 0   ;;  %s716_s18 = smov 0  }
   0x5 LB: > { %s731_s19 = sadd.s32 4294967295, %s678_s18   ;;  %s488_s20 = sadd.s32 4294967294, %s678_s18   ;;  %s678_s18 = sphi %s716_s18, %s916_s18   ;;  %s674_s17 = sphi %s714_s17, %s915_s17   ;;  %s670_s16 = sphi %s712_s16, %s914_s16   ;;  %s666_s15 = sphi %s710_s15, %s913_s15  }
   0x6   : > { %s735_s21 = sadd.s32 1, %s678_s18   ;;  %s27_s22 = sadd.s32 1, %s674_s17 }
   0x7   : > { %s24_s23 = ssub.s32 %s678_s18, %s735_s21  ;;  %p34_p0 = scmp.ne.s32.totalorder %s674_s17, %s670_s16 }
   0x8   : > { %p25_p1 = scmp.eq.s32.totalorder %s24_s23, 0  ;;  %p35_p2 = scmp.eq.s32.totalorder %s678_s18, 0 }
   0x9   : > { %p40_p3 = scmp.ne.s32.totalorder %s670_s16, %s666_s15  ;;  %p41_p4 = scmp.eq.s32.totalorder %s731_s19, 0 }
   0xa   : > { %s747_s24 = scalar_select %p25_p1, %s674_s17, %s27_s22  }
   0xb   : > { %p749_p5 = por %p35_p2, %p34_p0  ;;  %p753_p6 = por %p41_p4, %p40_p3 }
   0xc   : > { %p132_p7 = scmp.eq.s32.totalorder %s731_s19, 1  ;;  %p138_p8 = scmp.eq.s32.totalorder %s488_s20, 1 }
   0xd   : > { %p545_p10 = scmp.lt.s32.totalorder %s678_s18, 2  ;;  %s164_s29 = sand.u32 1, %s674_s17  }
   0xe   : > { %p760_p11 = por %p132_p7, %p34_p0  ;;  %p764_p12 = por %p138_p8, %p40_p3 }
   0xf   : > { %s492_s30 = sshll.u32 %s678_s18, 7  ;;  %s491_s5 = sshll.u32 %s164_s29, 3 }
  0x10   : > { %s905_s27 = scalar_select %p760_p11, 1, 0 }
  0x11   : > { %s906_s28 = scalar_select %p764_p12, 1, 0 }
  0x12   : > { %s773_s8 = scalar_lea.hbm %s897_s0, %s492_s30  ;;  %s168_s9 = scalar_lea.vmem [#allocation2], %s491_s5 }
  0x13   : > { %s175_s10 = sshll.u32 %s168_s9, 4  ;;  %p777_p13 = pnand %p545_p10, %p749_p5  ;;  %s781_s10 = int_to_ptr.vmem [resolvable:$true] %s175_s10 }
  0x14   : > { %s165_s12 = scalar_lea.sflag [#allocation3], %s164_s29  ;;  %s582_s13 = scalar_lea.hbm %s773_s8, 128 }
  0x15   : > { %p583_p2 = scmp.ne.s32.totalorder %s773_s8, %s582_s13  ;;  %p584_p3 = pneg %p777_p13 }
  0x16   : > { %s587_s22 = scalar_lea.hbm %s897_s0, 256  ;;  %p588_p5 = scmp.lt.u32.totalorder %s773_s8, %s897_s0 }
  0x17   : > { %p585_p4 = pnand %p584_p3, %p583_p2  ;;  %p589_p8 = scmp.lt.u32.totalorder %s587_s22, %s582_s13 }
  0x18   : > { %p591_p9 = scmp.lt.u32.totalorder %s582_s13, %s773_s8 }
  0x19   : > { %p586_p7 = pneg %p585_p4  ;;  %p590_p10 = por %p589_p8, %p588_p5 }
  0x1b   : > { %p592_p0 = por %p591_p9, %p590_p10 }
  0x1d   : > { %p593_p1 = pnand %p592_p0, %p586_p7 }
  0x1f   : > { %596 = shalt.err (!%p593_p1)
}
  0x20   : > { %s597_s29 = scalar_lea.vmem %s781_s10, 128  ;;  %s680_s30 = smov [#allocation2]  }
  0x21   : > { %p598_p2 = scmp.ne.s32.totalorder %s781_s10, %s597_s29  ;;  %s602_s5 = sshll.u32 %s680_s30, 4  ;;  %s603_s5 = int_to_ptr.vmem [resolvable:$false] %s602_s5 }
  0x22   : > { %s604_s6 = scalar_lea.vmem %s603_s5, 256  ;;  %p605_p11 = scmp.lt.s32.totalorder %s781_s10, %s603_s5 }
  0x23   : > { %p600_p4 = pnand %p598_p2, %p584_p3  ;;  %p606_p5 = scmp.lt.s32.totalorder %s604_s6, %s597_s29 }
  0x25   : > { %p601_p12 = pneg %p600_p4  ;;  %p607_p8 = por %p606_p5, %p605_p11 }
  0x27   : > { %p608_p9 = pnand %p607_p8, %p601_p12 }
  0x29   : > { %611 = shalt.err (!%p608_p9)
}
  0x2a   : > { %540 = dma.hbm_to_vmem [thread:$0]  (!%p777_p13), %s773_s8, 128, %s781_s10, %s165_s12  }
  0x2b   : > { %p908_p0 = scmp.lt.s32.totalorder %s678_s18, 3  ;;  %p909_p1 = scmp.ge.s32.totalorder %s678_s18, 1 }
  0x2d   : > { %p188_p3 = pnand %p909_p1, %p908_p0 }
  0x2e   : > { %s815_s7 = sand.u32 (!%p188_p3), 1, %s670_s16  }
  0x2f   : > { %191 = sbr.rel (%p188_p3) target bundleno = 506 (0x1fa), region = 36  ;;  %s494_s9 = sshll.u32 (!%p188_p3), %s815_s7, 3 }
  0x30   : > { %s194_s13 = scalar_lea.sflag (!%p188_p3), [#allocation3], %s815_s7  ;;  %s197_s11 = scalar_lea.vmem (!%p188_p3), [#allocation2], %s494_s9 }
  0x36   : > { %657 = dma.done.wait (%p753_p6), %s194_s13, 128  }
  0x37   : > { %659 = vsyncadd (%p753_p6), %s194_s13, 4294967168  ;;  %p226_p11 = scmp.lt.s32.totalorder %s731_s19, 1  ;;  %v681_v0 = vmov 0.0|0.0   ;;  %vm682_vm0 = vmmov 0   ;;  %v683_v1 = vmov 0.0   ;;  %v233_v2 = vld [vmem:[%s899_s2] sm:$0xff] }
  0x38   : > { %527 = vmatprep.subr.bf16.mxu0 %v681_v0  ;;  %519 = vmatprep.mubr.msk.f32.mxu0 %vm682_vm0, %v683_v1  ;;  %v234_v3 = vld [vmem:[%s899_s2 + $0x8] sm:$0xff]  ;;  %v235_v4 = vld [vmem:[%s899_s2 + $0x10] sm:$0xff]  ;;  %v236_v6 = vld [vmem:[%s899_s2 + $0x18] sm:$0xff]  ;;  %vm237_vm1 = vcmask 261120   ;;  %vm316_vm2 = vcmask 1043456   ;;  %vm312_vm3 = vcmask 31744  }
  0x39   : > { %s227_s8 = scalar_select %p226_p11, %s731_s19, 1  ;;  %522 = vmatprep.subr.mxu1 %v683_v1  ;;  %524 = vmatprep.mubr.msk.f32.mxu1 %vm682_vm0, %v683_v1  ;;  %v528_v5 = vpack.c.bf16 %v234_v3, %v233_v2  ;;  %v531_v7 = vpack.c.bf16 %v236_v6, %v235_v4  ;;  %v230_v8 = vld [vmem:[%s197_s11] sm:$0xff] }
  0x3a   : > { %v311_v11 = vld [vmem:[%s900_s3] sm:$0xf]  ;;  %s501_s11 = sshll.u32 %s731_s19, 7  ;;  %s393_s26 = scalar_lea.sflag [#allocation4], %s815_s7 }
  0x3b   : > { %s496_s10 = sshll.u32 %s227_s8, 3  ;;  %529 = vmatpush3.bf16.msra.mxu0 %v528_v5  ;;  %523 = vmatpush3.msk.msra.mxu1 %vm316_vm2, %v311_v11  ;;  %s852_s22 = scalar_lea.hbm %s901_s4, %s501_s11 }
  0x3c   : > { %s229_s30 = scalar_lea.vmem %s898_s1, %s496_s10  ;;  %530 = vmatprep.subr.bf16.mxu0 %v681_v0  ;;  %s225_s10 = scalar_lea.vmem [#allocation5], %s494_s9 }
  0x3d   : > { %v231_v9 = vld [vmem:[%s229_s30] sm:$0xff]  ;;  %s406_s12 = sshll.u32 %s225_s10, 4  ;;  %p910_p12 = scmp.ne.s32.totalorder %s905_s27, 0  ;;  %s854_s12 = int_to_ptr.vmem [resolvable:$true] %s406_s12 }
  0x3e   : > { %v232_v10 = vsub.f32 %v231_v9, %v230_v8  ;;  %s612_s19 = scalar_lea.vmem %s854_s12, 128  ;;  %s684_s9 = smov [#allocation5]  }
  0x3f   : > { %532 = vmatpush3.bf16.msra.mxu0 %v531_v7  ;;  %p613_p6 = scmp.ne.s32.totalorder %s854_s12, %s612_s19  ;;  %s616_s23 = sshll.u32 %s684_s9, 4  ;;  %s617_s23 = int_to_ptr.vmem [resolvable:$false] %s616_s23 }
  0x40   : > { %s618_s25 = scalar_lea.vmem %s617_s23, 256  ;;  %p619_p10 = scmp.lt.s32.totalorder %s854_s12, %s617_s23 }
  0x41   : > { %p614_p13 = pnand %p613_p6, %p910_p12  ;;  %p620_p2 = scmp.lt.s32.totalorder %s618_s25, %s612_s19 }
  0x42   : > { %520 = vmatmul.mubr.msk.f32.vlgmr.msra.gmra.mrb[0].mxu0 %vm237_vm1, %v232_v10 }
  0x43   : > { %p615_p7 = pneg %p614_p13  ;;  %p621_p4 = por %p620_p2, %p619_p10 }
  0x45   : > { %p622_p5 = pnand %p621_p4, %p615_p7 }
 0x115   : > { %v307_v12 = vpop.f32.mrb[0].mxu0 }
 0x116   : > { %v521_v13 = vpop.f32.mrb[1].mxu0  ;;  %525 = vmatmul.mubr.msk.f32.vlgmr.msra.gmra.mrb[0].mxu1 %vm312_vm3, %v307_v12 }
 0x1e9   : > { %v386_v14 = vpop.f32.mrb[0].mxu1 }
 0x1ea   : > { %v390_v15 = vadd.f32 %v386_v14, %v230_v8  ;;  %v526_v16 = vpop.f32.mrb[1].mxu1 }
 0x1ec   : > { %391 = vst.msk [vmem:[%s225_s10] sm:$0xff] %vm237_vm1, %v390_v15 }
 0x1ed   : > { %625 = shalt.err (!%p622_p5)
}
 0x1ee   : > { %s626_s7 = scalar_lea.hbm %s852_s22, 128  ;;  %s630_s5 = scalar_lea.hbm %s901_s4, 256 }
 0x1ef   : > { %p627_p8 = scmp.ne.s32.totalorder %s852_s22, %s626_s7  ;;  %p631_p1 = scmp.lt.u32.totalorder %s852_s22, %s901_s4 }
 0x1f0   : > { %p632_p3 = scmp.lt.u32.totalorder %s630_s5, %s626_s7  ;;  %p634_p6 = scmp.lt.u32.totalorder %s626_s7, %s852_s22 }
 0x1f1   : > { %p628_p9 = pnand %p627_p8, %p910_p12 }
 0x1f2   : > { %p633_p11 = por %p632_p3, %p631_p1 }
 0x1f3   : > { %p629_p0 = pneg %p628_p9 }
 0x1f4   : > { %p635_p13 = por %p634_p6, %p633_p11 }
 0x1f6   : > { %p636_p7 = pnand %p635_p13, %p629_p0 }
 0x1f8   : > { %639 = shalt.err (!%p636_p7)
}
 0x1f9   : > { %535 = dma.vmem_to_hbm [thread:$0]  (%p910_p12), %s854_s12, 128, %s852_s22, %s393_s26  }
 0x1fa PF: > { %s418_s8 = sand.u32 1, %s666_s15   ;;  %p911_p10 = scmp.ne.s32.totalorder %s906_s28, 0 }
 0x1fb   : > { %p912_p2 = scmp.ge.s32.totalorder %s678_s18, 2  ;;  %s419_s11 = scalar_lea.sflag [#allocation4], %s418_s8 }
 0x1fd   : > { %p542_p4 = pnand %p912_p2, %p911_p10 }
 0x1ff   : > { %661 = dma.done.wait (!%p542_p4), %s419_s11, 128  }
 0x200   : > { %663 = vsyncadd (!%p542_p4), %s419_s11, 4294967168  ;;  %p17_p5 = scmp.ge.s32.totalorder %s735_s21, 4   ;;  %s913_s15 = smov %s670_s16 }
 0x201   : > { %s914_s16 = smov %s674_s17  ;;  %s915_s17 = smov %s747_s24 }
 0x202   : > { %s916_s18 = smov %s735_s21  ;;  %19 = sbr.rel (!%p17_p5) target bundleno = 5 (0x5), region = 84 }
 0x209   :  { %424 = vsyncpa [#allocation3], 1 }
 0x20a   :  { %426 = vsyncpa [#allocation3 + $0x1], 1 }
 0x20b   :  { %427 = vsyncpa [#allocation4], 1 }
 0x20c   :  { %429 = vsyncpa [#allocation4 + $0x1], 1 }

</bundles_post_ra>
